<compile_context>
chip_gen: v7x
topology: tpu7x:2x2x1
jax: 0.10.0
libtpu: 0.0.40
codegen_flags: <defaults>
</compile_context>

<pallas_src>
import jax
import jax.numpy as jnp
from jax.experimental import pallas as pl
from jax.experimental.pallas import tpu as pltpu


def _round_up(x, m):
    return ((x + m - 1) // m) * m


def _vmem_budget_bytes():
    """Scoped-VMEM budget with headroom; v7x only has 64 MiB physical."""
    try:
        cap = pltpu.get_tpu_info().vmem_capacity_bytes
    except Exception:
        cap = 64 * 1024 * 1024  # conservative fallback: assume v7x
    # ~25% headroom for compiler-internal scratch / pipeline state; cap at 96 MiB.
    return min(int(cap * 3 // 4), 96 * 1024 * 1024)


# ---------------------------------------------------------------------------
# Kernels
# ---------------------------------------------------------------------------
def _ease_kernel_single(x_ref, a_ref, o_ref):
    """Fast path: A fully resident in VMEM, one matmul + fused sigmoid per x tile."""
    acc = jnp.dot(x_ref[...], a_ref[...], preferred_element_type=jnp.float32)
    o_ref[...] = jax.nn.sigmoid(acc).astype(o_ref.dtype)


def _ease_kernel_accum_out(x_ref, a_ref, o_ref):
    """General path, f32 output: accumulate directly into o_ref (no scratch)."""
    k = pl.program_id(2)

    @pl.when(k == 0)
    def _init():
        o_ref[...] = jnp.zeros_like(o_ref)

    o_ref[...] += jnp.dot(x_ref[...], a_ref[...], preferred_element_type=jnp.float32)

    @pl.when(k == pl.num_programs(2) - 1)
    def _finalize():
        o_ref[...] = jax.nn.sigmoid(o_ref[...])


def _ease_kernel_scratch(x_ref, a_ref, o_ref, acc_ref):
    """General path, non-f32 output: f32 VMEM accumulator, cast at last K step."""
    k = pl.program_id(2)

    @pl.when(k == 0)
    def _init():
        acc_ref[...] = jnp.zeros_like(acc_ref)

    acc_ref[...] += jnp.dot(x_ref[...], a_ref[...], preferred_element_type=jnp.float32)

    @pl.when(k == pl.num_programs(2) - 1)
    def _finalize():
        o_ref[...] = jax.nn.sigmoid(acc_ref[...]).astype(o_ref.dtype)


# ---------------------------------------------------------------------------
# Wrapper
# ---------------------------------------------------------------------------
def ease_forward(x, weight, *, use_bf16=True, out_dtype=None):
    """sigmoid(x @ (triu(W) + triu(W, 1).T)) with tiled Pallas TPU kernels."""
    B, H = x.shape
    assert weight.shape == (H, H)
    out_dtype = jnp.dtype(x.dtype if out_dtype is None else out_dtype)

    mm_dtype = jnp.bfloat16 if use_bf16 else jnp.dtype(x.dtype)
    mm_bytes = jnp.dtype(mm_dtype).itemsize
    out_bytes = out_dtype.itemsize

    # Build the symmetric matrix once, already in the matmul dtype (pure copies
    # of W entries, so casting first is bit-identical to casting afterwards).
    w_mm = weight.astype(mm_dtype)
    A = jnp.triu(w_mm) + jnp.triu(w_mm, 1).T
    x_mm = x.astype(mm_dtype)

    vmem_budget = _vmem_budget_bytes()
    m_align = 16 if mm_bytes == 2 else 8  # sublane packing granularity
    tm_candidates = (512, 256, 128, 64, 32, 16, 8)

    def _pad(arr, shape):
        if arr.shape == shape:
            return arr
        return jnp.zeros(shape, arr.dtype).at[: arr.shape[0], : arr.shape[1]].set(arr)

    # ---------------- Fast path: A fully resident in VMEM, no K axis ---------
    H_pad_fast = _round_up(H, 128)
    a_resident_bytes = 2 * H_pad_fast * H_pad_fast * mm_bytes  # allow double-buffer
    tm_fast = None
    if a_resident_bytes <= int(vmem_budget * 0.6):
        rest = vmem_budget - a_resident_bytes
        b_cap = max(_round_up(B, m_align), m_align)
        for cand in tm_candidates:
            if cand < m_align or cand > b_cap:
                continue
            need = 2 * cand * H_pad_fast * (mm_bytes + out_bytes)
            if need <= rest:
                tm_fast = cand
                break

    if tm_fast is not None:
        tm, H_pad = tm_fast, H_pad_fast
        B_pad = _round_up(B, tm)
        x_p = _pad(x_mm, (B_pad, H_pad))
        A_p = _pad(A, (H_pad, H_pad))

        cost = pl.CostEstimate(
            flops=2 * B_pad * H_pad * H_pad,
            transcendentals=B_pad * H_pad,
            bytes_accessed=(B_pad * H_pad + H_pad * H_pad) * mm_bytes
            + B_pad * H_pad * out_bytes,
        )
        out_p = pl.pallas_call(
            _ease_kernel_single,
            out_shape=jax.ShapeDtypeStruct((B_pad, H_pad), out_dtype),
            grid_spec=pltpu.PrefetchScalarGridSpec(
                num_scalar_prefetch=0,
                grid=(B_pad // tm,),
                in_specs=[
                    pl.BlockSpec((tm, H_pad), lambda i: (i, 0)),
                    # Constant block index: A is DMA'd once and stays resident.
                    pl.BlockSpec((H_pad, H_pad), lambda i: (0, 0)),
                ],
                out_specs=pl.BlockSpec((tm, H_pad), lambda i: (i, 0)),
            ),
            compiler_params=pltpu.CompilerParams(
                dimension_semantics=("parallel",),
                vmem_limit_bytes=vmem_budget,
            ),
            cost_estimate=cost,
        )(x_p, A_p)
        return out_p[:B, :H]

    # ---------------- General path: (i, j, k) grid with K reduction ----------
    # N/K tile: prefer the largest of 512/256/128 that divides H (no H padding
    # copy), else the largest that fits, else 128.
    tn = None
    for cand in (512, 256, 128):
        if H % cand == 0:
            tn = cand
            break
    if tn is None:
        for cand in (512, 256, 128):
            if H >= cand:
                tn = cand
                break
    if tn is None:
        tn = 128
    tk = tn
    H_pad = _round_up(H, tn)

    # M tile: as large as the VMEM budget allows (amortizes A re-streaming,
    # (B_pad/tm) full passes over A, and the ~0.35 us per-grid-step overhead).
    acc_bytes = 0 if out_dtype == jnp.float32 else 4
    b_cap = max(_round_up(B, m_align), m_align)
    tm = m_align
    for cand in tm_candidates:
        if cand < m_align or cand > b_cap:
            continue
        need = (
            2 * cand * tk * mm_bytes      # x blocks (double-buffered)
            + 2 * tk * tn * mm_bytes      # A blocks (double-buffered)
            + 2 * cand * tn * out_bytes   # output block
            + cand * tn * acc_bytes       # f32 scratch (non-f32 output only)
        )
        if need <= vmem_budget:
            tm = cand
            break
    B_pad = _round_up(B, tm)

    x_p = _pad(x_mm, (B_pad, H_pad))
    A_p = _pad(A, (H_pad, H_pad))

    grid = (B_pad // tm, H_pad // tn, H_pad // tk)
    cost = pl.CostEstimate(
        flops=2 * B_pad * H_pad * H_pad,
        transcendentals=B_pad * H_pad,
        bytes_accessed=(B_pad // tm) * H_pad * H_pad * mm_bytes
        + (H_pad // tn) * B_pad * H_pad * mm_bytes
        + B_pad * H_pad * out_bytes,
    )

    if out_dtype == jnp.float32:
        kernel = _ease_kernel_accum_out
        scratch = []
    else:
        kernel = _ease_kernel_scratch
        scratch = [pltpu.VMEM((tm, tn), jnp.float32)]

    out_p = pl.pallas_call(
        kernel,
        out_shape=jax.ShapeDtypeStruct((B_pad, H_pad), out_dtype),
        grid_spec=pltpu.PrefetchScalarGridSpec(
            num_scalar_prefetch=0,
            grid=grid,
            in_specs=[
                pl.BlockSpec((tm, tk), lambda i, j, k: (i, k)),
                pl.BlockSpec((tk, tn), lambda i, j, k: (k, j)),
            ],
            out_specs=pl.BlockSpec((tm, tn), lambda i, j, k: (i, j)),
            scratch_shapes=scratch,
        ),
        compiler_params=pltpu.CompilerParams(
            dimension_semantics=("parallel", "parallel", "arbitrary"),
            vmem_limit_bytes=vmem_budget,
        ),
        cost_estimate=cost,
    )(x_p, A_p)
    return out_p[:B, :H]


def make_weight(key, hidden_size):
    # torch.rand(H, H).fill_diagonal_(0): uniform [0, 1) with zero diagonal.
    w = jax.random.uniform(key, (hidden_size, hidden_size), dtype=jnp.float32)
    w = w * (1.0 - jnp.eye(hidden_size, dtype=jnp.float32))
    return w


if __name__ == "__main__":
    key = jax.random.PRNGKey(0)
    k_w, k_x = jax.random.split(key)

    B, H = 8, 32
    weight = make_weight(k_w, H)
    x = jax.random.normal(k_x, (B, H), dtype=jnp.float32)

    out = ease_forward(x, weight)
    jax.block_until_ready(out)

    # Reference in plain JAX (full f32), same semantics as the PyTorch module.
    A_ref = jnp.triu(weight) + jnp.triu(weight, 1).T
    ref = jax.nn.sigmoid(x @ A_ref)
    # bf16 MXU operands => slightly looser tolerance (sigmoid output in [0, 1]).
    assert jnp.allclose(out, ref, atol=2e-2, rtol=0.0), "mismatch vs reference"

    # Exact-path (f32 operands) agreement, tight tolerance.
    out_f32 = ease_forward(x, weight, use_bf16=False)
    jax.block_until_ready(out_f32)
    assert jnp.allclose(out_f32, ref, atol=1e-5, rtol=1e-5), "f32 mismatch vs reference"

    print("KERNEL_OK")
</pallas_src>

<mosaic_0001>
module attributes {stable_mosaic.version = 11 : i64} {
  func.func @_ease_kernel_single(%arg0: i32, %arg1: memref<16x128xbf16, #tpu.memory_space<vmem>>, %arg2: memref<128x128xbf16, #tpu.memory_space<vmem>>, %arg3: memref<16x128xf32, #tpu.memory_space<vmem>>) attributes {dimension_semantics = [#tpu.dimension_semantics<parallel>], iteration_bounds = array<i64: 1>, scalar_prefetch = 0 : i64, scratch_operands = 0 : i64, tpu.core_type = #tpu.core_type<tc>, window_params = [{transform_indices = @transform_0, window_bounds = array<i64: 16, 128>}, {pipeline_mode = #tpu.pipeline_mode<synchronous>, transform_indices = @transform_1, window_bounds = array<i64: 128, 128>}, {transform_indices = @transform_2, window_bounds = array<i64: 16, 128>}]} {
    %c0 = arith.constant 0 : index
    %c0_0 = arith.constant 0 : index
    %0 = vector.load %arg1[%c0, %c0_0] : memref<16x128xbf16, #tpu.memory_space<vmem>>, vector<16x128xbf16>
    %c0_1 = arith.constant 0 : index
    %c0_2 = arith.constant 0 : index
    %1 = vector.load %arg2[%c0_1, %c0_2] : memref<128x128xbf16, #tpu.memory_space<vmem>>, vector<128x128xbf16>
    %cst = arith.constant dense<0.000000e+00> : vector<16x128xf32>
    %2 = tpu.matmul %0, %1, %cst {dimension_numbers = #tpu.dot_dimension_numbers<[1], [0], [0], [1], [0, 0, 1, 1], [], []>} : vector<16x128xbf16>, vector<128x128xbf16>, vector<16x128xf32> -> vector<16x128xf32>
    %3 = arith.negf %2 : vector<16x128xf32>
    %4 = math.exp %3 : vector<16x128xf32>
    %cst_3 = arith.constant 1.000000e+00 : f32
    %5 = vector.broadcast %cst_3 : f32 to vector<16x128xf32>
    %6 = arith.addf %5, %4 : vector<16x128xf32>
    %7 = arith.divf %5, %6 : vector<16x128xf32>
    %c0_4 = arith.constant 0 : index
    %c0_5 = arith.constant 0 : index
    %8 = vector.load %arg3[%c0_4, %c0_5] : memref<16x128xf32, #tpu.memory_space<vmem>>, vector<16x128xf32>
    tpu.vector_store %arg3[%c0_4, %c0_5], %7 {strides = array<i32>} : memref<16x128xf32, #tpu.memory_space<vmem>>, vector<16x128xf32>,
    return
  }
  func.func @transform_0(%arg0: i32) -> (i32, i32) {
    %c0_i32 = arith.constant 0 : i32
    %c0_i32_0 = arith.constant 0 : i32
    return %arg0, %c0_i32 : i32, i32
  }
  func.func @transform_1(%arg0: i32) -> (i32, i32) {
    %c0_i32 = arith.constant 0 : i32
    %c0_i32_0 = arith.constant 0 : i32
    %c0_i32_1 = arith.constant 0 : i32
    return %c0_i32, %c0_i32_0 : i32, i32
  }
  func.func @transform_2(%arg0: i32) -> (i32, i32) {
    %c0_i32 = arith.constant 0 : i32
    %c0_i32_0 = arith.constant 0 : i32
    return %arg0, %c0_i32 : i32, i32
  }
}

</mosaic_0001>

<bundles_post_ra>
// kernel: tpu_custom_call.1
= control target key start
LH: loop header
LB: loop body
LE: loop exit
PB: predicated region body
PF: predicated region fallthrough
CT: control target
= control target key end

     0   :  { %7 = vsyncpa [#allocation3], 0  ;;  %s384_s0 = inlined_call_operand.hbm [shape: bf16[16,128], index: 0, kind: input, shape index: {}]   ;;  %s385_s1 = inlined_call_operand.hbm [shape: bf16[128,128], index: 1, kind: input, shape index: {}]   ;;  %s386_s2 = inlined_call_operand.hbm [shape: f32[16,128], index: 2, kind: output, shape index: {}]  }
   0x1   :  { %8 = vsyncpa [#allocation6], 0 }
   0x2   :  { %9 = vsyncpa [#allocation4], 0  ;;  %s324_s9 = smov [#allocation2]   ;;  %s252_s13 = scalar_lea.hbm %s384_s0, 128 }
   0x3   :  { %s15_s10 = sshll.u32 %s324_s9, 4  ;;  %p253_p0 = scmp.ne.s32.totalorder %s384_s0, %s252_s13  ;;  %s16_s10 = int_to_ptr.vmem [resolvable:$true] %s15_s10 }
   0x4   :  { %p256_p1 = scmp.lt.u32.totalorder %s252_s13, %s384_s0 }
   0x6   :  { %p258_p2 = pnand %p256_p1, %p253_p0 }
   0x8   :  { %261 = shalt.err (!%p258_p2)
}
   0x9   :  { %s262_s18 = scalar_lea.vmem %s16_s10, 128  ;;  %p267_p4 = scmp.lt.s32.totalorder %s16_s10, %s16_s10 }
   0xa   :  { %p263_p3 = scmp.ne.s32.totalorder %s16_s10, %s262_s18  ;;  %p268_p5 = scmp.lt.s32.totalorder %s262_s18, %s262_s18 }
   0xc   :  { %p269_p6 = por %p268_p5, %p267_p4 }
   0xe   :  { %p270_p7 = pnand %p269_p6, %p263_p3 }
  0x10   :  { %273 = shalt.err (!%p270_p7)
}
  0x11   :  { %s325_s19 = smov 64   ;;  %s326_s20 = smov 4  }
  0x12   :  { %21 = dma.hbm_to_vmem [thread:$0]  %s384_s0, 128, %s16_s10, [#allocation3], %s325_s19, %s325_s19, %s326_s20  }
  0x13   :  { %s327_s23 = smov [#allocation5]   ;;  %s274_s27 = scalar_lea.hbm %s385_s1, 1024 }
  0x14   :  { %s27_s24 = sshll.u32 %s327_s23, 4  ;;  %p275_p8 = scmp.ne.s32.totalorder %s385_s1, %s274_s27  ;;  %s28_s24 = int_to_ptr.vmem [resolvable:$true] %s27_s24 }
  0x15   :  { %p278_p9 = scmp.lt.u32.totalorder %s274_s27, %s385_s1 }
  0x17   :  { %p280_p10 = pnand %p278_p9, %p275_p8 }
  0x19   :  { %283 = shalt.err (!%p280_p10)
}
  0x1a   :  { %s284_s4 = scalar_lea.vmem %s28_s24, 1024  ;;  %p289_p12 = scmp.lt.s32.totalorder %s28_s24, %s28_s24 }
  0x1b   :  { %p285_p11 = scmp.ne.s32.totalorder %s28_s24, %s284_s4  ;;  %p290_p13 = scmp.lt.s32.totalorder %s284_s4, %s284_s4 }
  0x1d   :  { %p291_p0 = por %p290_p13, %p289_p12 }
  0x1f   :  { %p292_p1 = pnand %p291_p0, %p285_p11 }
  0x21   :  { %295 = shalt.err (!%p292_p1)
}
  0x22   :  { %33 = dma.hbm_to_vmem [thread:$0]  %s385_s1, 1024, %s28_s24, [#allocation6], %s325_s19, %s325_s19, %s326_s20  }
  0x23   :  { %318 = dma.done.wait [#allocation3], 128  }
  0x24   :  { %319 = vsyncadd [#allocation3], 4294967168 }
  0x25   :  { %320 = dma.done.wait [#allocation6], 1024  }
  0x26   :  { %321 = vsyncadd [#allocation6], 4294966272  ;;  %v328_v0 = vmov 0.0   ;;  %vm329_vm0 = vmmov 0   ;;  %v235_v1 = vld [vmem:[#allocation5] sm:$0xff]   ;;  %v236_v2 = vld [vmem:[#allocation5 + $0x8] sm:$0xff]  }
  0x27   :  { %206 = vmatprep.subr.bf16.mxu0 %v328_v0  ;;  %222 = vmatprep.mubr.msk.bf16.mxu0 %vm329_vm0, %v328_v0  ;;  %v237_v3 = vld [vmem:[#allocation5 + $0x10] sm:$0xff]   ;;  %v238_v4 = vld [vmem:[#allocation5 + $0x18] sm:$0xff]   ;;  %v239_v5 = vld [vmem:[#allocation5 + $0x20] sm:$0xff]   ;;  %s330_s1 = smov [#allocation7]  }
  0x28   :  { %207 = vmatpush3.bf16.msra.mxu0 %v235_v1  ;;  %v240_v6 = vld [vmem:[#allocation5 + $0x28] sm:$0xff]   ;;  %v241_v7 = vld [vmem:[#allocation5 + $0x30] sm:$0xff]   ;;  %v242_v8 = vld [vmem:[#allocation5 + $0x38] sm:$0xff]   ;;  %s173_s6 = sshll.u32 %s330_s1, 4  ;;  %s174_s6 = int_to_ptr.vmem [resolvable:$true] %s173_s6 }
  0x29   :  { %208 = vmatprep.subr.bf16.mxu0 %v328_v0  ;;  %v243_v9 = vld [vmem:[#allocation2] sm:$0xff]   ;;  %s296_s7 = scalar_lea.vmem %s174_s6, 256  ;;  %p301_p3 = scmp.lt.s32.totalorder %s174_s6, %s174_s6 }
  0x2a   :  { %p297_p2 = scmp.ne.s32.totalorder %s174_s6, %s296_s7  ;;  %p302_p4 = scmp.lt.s32.totalorder %s296_s7, %s296_s7 }
  0x2c   :  { %209 = vmatpush3.bf16.msra.mxu0 %v236_v2  ;;  %p303_p5 = por %p302_p4, %p301_p3 }
  0x2d   :  { %210 = vmatprep.subr.bf16.mxu0 %v328_v0 }
  0x2e   :  { %p304_p6 = pnand %p303_p5, %p297_p2 }
  0x30   :  { %211 = vmatpush3.bf16.msra.mxu0 %v237_v3 }
  0x31   :  { %212 = vmatprep.subr.bf16.mxu0 %v328_v0 }
  0x34   :  { %213 = vmatpush3.bf16.msra.mxu0 %v238_v4 }
  0x35   :  { %214 = vmatprep.subr.bf16.mxu0 %v328_v0 }
  0x38   :  { %215 = vmatpush3.bf16.msra.mxu0 %v239_v5 }
  0x39   :  { %216 = vmatprep.subr.bf16.mxu0 %v328_v0 }
  0x3c   :  { %217 = vmatpush3.bf16.msra.mxu0 %v240_v6 }
  0x3d   :  { %218 = vmatprep.subr.bf16.mxu0 %v328_v0 }
  0x40   :  { %219 = vmatpush3.bf16.msra.mxu0 %v241_v7 }
  0x41   :  { %220 = vmatprep.subr.bf16.mxu0 %v328_v0 }
  0x44   :  { %221 = vmatpush3.bf16.msra.mxu0 %v242_v8 }
  0x47   :  { %223 = vmatmul.mubr.bf16.vlgmr.msra.gmra.mrb[0].mxu0 %v243_v9 }
 0x11a   :  { %v147_v10 = vpop.f32.mrb[0].mxu0 }
 0x11b   :  { %v195_v11 = vmul.f32 -1.442695, %v147_v10  ;;  %v224_v12 = vpop.f32.mrb[1].mxu0 }
 0x11c   :  { %v150_v13 = vpop.f32.mrb[2].mxu0 }
 0x11d   :  { %244 = vpow2.f32 %v195_v11  ;;  %v196_v14 = vmul.f32 -1.442695, %v150_v13  ;;  %v225_v15 = vpop.f32.mrb[3].mxu0 }
 0x11f   :  { %246 = vpow2.f32 %v196_v14 }
 0x127   :  { %v245_v16 = vpop.eup %244 }
 0x128   :  { %v160_v17 = vadd.f32 1.0, %v245_v16 }
 0x129   :  { %v247_v18 = vpop.eup %246 }
 0x12a   :  { %248 = vrcp.f32 %v160_v17  ;;  %v161_v19 = vadd.f32 1.0, %v247_v18 }
 0x12c   :  { %250 = vrcp.f32 %v161_v19 }
 0x134   :  { %v249_v20 = vpop.eup %248 }
 0x135   :  { %166 = vst [vmem:[#allocation7] sm:$0xff] %v249_v20 }
 0x136   :  { %v251_v21 = vpop.eup %250 }
 0x137   :  { %167 = vst [vmem:[#allocation7 + $0x8] sm:$0xff] %v251_v21 }
 0x138   :  { %307 = shalt.err (!%p304_p6)
}
 0x139   :  { %s308_s10 = scalar_lea.hbm %s386_s2, 256 }
 0x13a   :  { %p309_p7 = scmp.ne.s32.totalorder %s386_s2, %s308_s10  ;;  %p312_p8 = scmp.lt.u32.totalorder %s308_s10, %s386_s2 }
 0x13c   :  { %p314_p9 = pnand %p312_p8, %p309_p7 }
 0x13e   :  { %317 = shalt.err (!%p314_p9)
}
 0x13f   :  { %s331_s15 = smov 128   ;;  %s332_s16 = smov 8  }
 0x140   :  { %179 = dma.vmem_to_hbm [thread:$0]  %s174_s6, 256, %s386_s2, [#allocation4], %s331_s15, %s331_s15, %s332_s16  }
 0x141   :  { %322 = dma.done.wait [#allocation4], 256  }
 0x142   :  { %323 = vsyncadd [#allocation4], 4294967040 }
 0x143   :  { %183 = vsyncpa [#allocation3], 1 }
 0x144   :  { %184 = vsyncpa [#allocation6], 1 }
 0x145   :  { %185 = vsyncpa [#allocation4], 1 }

</bundles_post_ra>
